<compile_context>
chip_gen: v7x
topology: tpu7x:2x2x1
jax: 0.10.0
libtpu: 0.0.40
codegen_flags: <defaults>
</compile_context>

<pallas_src>
import jax
import jax.numpy as jnp
from jax.experimental import pallas as pl
from jax.experimental.pallas import tpu as pltpu


def _round_up(x, m):
    return (x + m - 1) // m * m


def _vmem_cap_bytes():
    # Per-generation VMEM cap with ~15% headroom; conservative fallback.
    try:
        phys = pltpu.get_tpu_info().vmem_capacity_bytes
        return int(phys * 0.85)
    except Exception:
        return 48 << 20


def residual_linear_kernel(x_ref, w_ref, b_ref, o_ref):
    """out = (x @ W + b) + x  -- fn(x) + x fused, f32 accumulation on the MXU."""
    x = x_ref[...]                                                   # (tm, Dp)
    y = jnp.dot(x, w_ref[...], preferred_element_type=jnp.float32)  # MXU
    o_ref[...] = (y + b_ref[...] + x).astype(o_ref.dtype)           # bias + residual


def residual_apply(x, w, b, *, target_tm=1024):
    """x: (B, N, D).  Returns fn(x) + x with fn = Linear(D, D) (weight w, bias b)."""
    B, N, D = x.shape
    M = B * N
    itemsize = jnp.dtype(x.dtype).itemsize

    xf = x.reshape(M, D)

    # ---- Lane-dense layout without copying x --------------------------------
    if D % 128 == 0:
        # Already lane-dense: no copies at all.
        r, Dp = 1, D
        x2, w2, b2 = xf, w, b.reshape(1, D)
    elif 128 % D == 0:
        # Fold r rows into one 128-lane row (free contiguous reshape) and use
        # a block-diagonal weight so each original row still sees its own x@W.
        r = 128 // D
        Dp = 128
        Mr = _round_up(M, r)
        if Mr != M:
            xf = jnp.pad(xf, ((0, Mr - M), (0, 0)))
        x2 = xf.reshape(Mr // r, Dp)
        w2 = jnp.kron(jnp.eye(r, dtype=w.dtype), w)        # (128, 128) block-diag
        b2 = jnp.tile(b, r).reshape(1, Dp)
    else:
        # General case: zero-pad features to a lane multiple (exact: padded
        # W rows/cols are zero, padded output cols are sliced off).
        r = 1
        Dp = _round_up(D, 128)
        x2 = jnp.pad(xf, ((0, 0), (0, Dp - D)))
        w2 = jnp.pad(w, ((0, Dp - D), (0, Dp - D)))
        b2 = jnp.pad(b, (0, Dp - D)).reshape(1, Dp)

    Mrows = x2.shape[0]

    # ---- VMEM budget: resident W/b + double-buffered x/out tiles ------------
    vmem_cap = _vmem_cap_bytes()
    w_bytes = Dp * Dp * itemsize
    b_bytes = Dp * itemsize
    tile_budget = vmem_cap - (w_bytes + b_bytes)
    # TODO(synk): if tile_budget < 4 * 8 * Dp * itemsize (huge D), switch to a
    # K-tiled grid with an accumulator instead of a resident (Dp, Dp) W.
    max_tm = max(8, (tile_budget // (4 * Dp * itemsize)) // 8 * 8)
    tgt_tm = max(8, min(_round_up(target_tm, 8), max_tm))

    # ---- Row tiling: ~tgt_tm rows/step, minimal padding, >=2 steps if possible
    if Mrows <= 8:
        tm, steps, Mp = Mrows, 1, Mrows          # block == full extent, no pad
    else:
        Mrows8 = _round_up(Mrows, 8)
        steps = max(1, pl.cdiv(Mrows8, tgt_tm))
        if steps < 2 and Mrows8 >= 16:
            steps = 2                            # keep both v7x TensorCores busy
        tm = _round_up(pl.cdiv(Mrows8, steps), 8)
        Mp = tm * steps                          # < 8 padded rows per step
    if Mp != Mrows:
        x2 = jnp.pad(x2, ((0, Mp - Mrows), (0, 0)))

    vmem_limit = int(min(vmem_cap,
                         max(32 << 20,
                             w_bytes + b_bytes + 4 * tm * Dp * itemsize + (4 << 20))))

    # Real (unpadded) traffic / flops so XLA schedules neighbors correctly.
    cost = pl.CostEstimate(
        flops=2 * M * D * D + 2 * M * D,
        transcendentals=0,
        bytes_accessed=2 * M * D * itemsize + w_bytes + b_bytes,
    )

    out = pl.pallas_call(
        residual_linear_kernel,
        out_shape=jax.ShapeDtypeStruct((Mp, Dp), x.dtype),
        grid_spec=pltpu.PrefetchScalarGridSpec(
            num_scalar_prefetch=0,
            grid=(steps,),
            in_specs=[
                # x rows: pipelined (double-buffered) big lane-dense tiles.
                pl.BlockSpec((tm, Dp), lambda i: (i, 0)),
                # weight: constant index_map -> resident, single-buffered.
                pl.BlockSpec((Dp, Dp), lambda i: (0, 0),
                             pipeline_mode=pl.Buffered(1)),
                # bias: constant index_map -> resident, single-buffered.
                pl.BlockSpec((1, Dp), lambda i: (0, 0),
                             pipeline_mode=pl.Buffered(1)),
            ],
            out_specs=pl.BlockSpec((tm, Dp), lambda i: (i, 0)),
        ),
        compiler_params=pltpu.CompilerParams(
            dimension_semantics=("parallel",),
            vmem_limit_bytes=vmem_limit,
        ),
        cost_estimate=cost,
    )(x2, w2, b2)

    # ---- Undo (only the) padding that was actually applied ------------------
    if Mp != Mrows:
        out = out[:Mrows]
    if r > 1:
        out = out.reshape(Mrows * r, D)
        if Mrows * r != M:
            out = out[:M]
    elif Dp != D:
        out = out[:, :D]
    return out.reshape(B, N, D)


if __name__ == "__main__":
    key = jax.random.PRNGKey(0)
    kx, kw, kb = jax.random.split(key, 3)

    B, N, D = 2, 8, 32
    x = jax.random.normal(kx, (B, N, D), dtype=jnp.float32)

    # Deterministic parameters for fn = Linear(D, D)  (nn.Linear-style init).
    bound = 1.0 / (D ** 0.5)
    w = jax.random.uniform(kw, (D, D), minval=-bound, maxval=bound,
                           dtype=jnp.float32)
    b = jax.random.uniform(kb, (D,), minval=-bound, maxval=bound,
                           dtype=jnp.float32)

    out = residual_apply(x, w, b)
    out = jax.block_until_ready(out)

    # Reference: fn(x) + x in plain JAX.
    ref = (jnp.einsum("bnd,de->bne", x, w) + b) + x
    assert out.shape == x.shape and out.dtype == x.dtype
    assert jnp.allclose(out, ref, atol=1e-5, rtol=1e-5), "mismatch vs reference"

    print("KERNEL_OK")
</pallas_src>

<mosaic_0001>
module attributes {stable_mosaic.version = 11 : i64} {
  func.func @residual_linear_kernel(%arg0: i32, %arg1: memref<4x128xf32, #tpu.memory_space<vmem>>, %arg2: memref<128x128xf32, #tpu.memory_space<vmem>>, %arg3: memref<1x128xf32, #tpu.memory_space<vmem>>, %arg4: memref<4x128xf32, #tpu.memory_space<vmem>>) attributes {dimension_semantics = [#tpu.dimension_semantics<parallel>], iteration_bounds = array<i64: 1>, scalar_prefetch = 0 : i64, scratch_operands = 0 : i64, tpu.core_type = #tpu.core_type<tc>, window_params = [{transform_indices = @transform_0, window_bounds = array<i64: 4, 128>}, {pipeline_mode = #tpu.pipeline_mode<synchronous>, transform_indices = @transform_1, window_bounds = array<i64: 128, 128>}, {pipeline_mode = #tpu.pipeline_mode<synchronous>, transform_indices = @transform_2, window_bounds = array<i64: 1, 128>}, {transform_indices = @transform_3, window_bounds = array<i64: 4, 128>}]} {
    %c0 = arith.constant 0 : index
    %c0_0 = arith.constant 0 : index
    %0 = vector.load %arg1[%c0, %c0_0] : memref<4x128xf32, #tpu.memory_space<vmem>>, vector<4x128xf32>
    %c0_1 = arith.constant 0 : index
    %c0_2 = arith.constant 0 : index
    %1 = vector.load %arg2[%c0_1, %c0_2] : memref<128x128xf32, #tpu.memory_space<vmem>>, vector<128x128xf32>
    %cst = arith.constant dense<0.000000e+00> : vector<4x128xf32>
    %2 = tpu.matmul %0, %1, %cst {dimension_numbers = #tpu.dot_dimension_numbers<[1], [0], [0], [1], [0, 0, 1, 1], [], []>} : vector<4x128xf32>, vector<128x128xf32>, vector<4x128xf32> -> vector<4x128xf32>
    %c0_3 = arith.constant 0 : index
    %c0_4 = arith.constant 0 : index
    %3 = vector.load %arg3[%c0_3, %c0_4] : memref<1x128xf32, #tpu.memory_space<vmem>>, vector<1x128xf32>
    %4 = vector.broadcast %3 : vector<1x128xf32> to vector<4x128xf32>
    %5 = arith.addf %2, %4 : vector<4x128xf32>
    %6 = arith.addf %5, %0 : vector<4x128xf32>
    %c0_5 = arith.constant 0 : index
    %c0_6 = arith.constant 0 : index
    %7 = vector.load %arg4[%c0_5, %c0_6] : memref<4x128xf32, #tpu.memory_space<vmem>>, vector<4x128xf32>
    tpu.vector_store %arg4[%c0_5, %c0_6], %6 {strides = array<i32>} : memref<4x128xf32, #tpu.memory_space<vmem>>, vector<4x128xf32>,
    return
  }
  func.func @transform_0(%arg0: i32) -> (i32, i32) {
    %c0_i32 = arith.constant 0 : i32
    %c0_i32_0 = arith.constant 0 : i32
    return %arg0, %c0_i32 : i32, i32
  }
  func.func @transform_1(%arg0: i32) -> (i32, i32) {
    %c0_i32 = arith.constant 0 : i32
    %c0_i32_0 = arith.constant 0 : i32
    %c0_i32_1 = arith.constant 0 : i32
    return %c0_i32, %c0_i32_0 : i32, i32
  }
  func.func @transform_2(%arg0: i32) -> (i32, i32) {
    %c0_i32 = arith.constant 0 : i32
    %c0_i32_0 = arith.constant 0 : i32
    %c0_i32_1 = arith.constant 0 : i32
    return %c0_i32, %c0_i32_0 : i32, i32
  }
  func.func @transform_3(%arg0: i32) -> (i32, i32) {
    %c0_i32 = arith.constant 0 : i32
    %c0_i32_0 = arith.constant 0 : i32
    return %arg0, %c0_i32 : i32, i32
  }
}

</mosaic_0001>

<bundles_post_ra>
// kernel: tpu_custom_call.1
= control target key start
LH: loop header
LB: loop body
LE: loop exit
PB: predicated region body
PF: predicated region fallthrough
CT: control target
= control target key end

     0   :  { %8 = vsyncpa [#allocation3], 0  ;;  %s384_s0 = inlined_call_operand.hbm [shape: f32[4,128], index: 0, kind: input, shape index: {}]   ;;  %s385_s1 = inlined_call_operand.hbm [shape: f32[128,128], index: 1, kind: input, shape index: {}]   ;;  %s386_s2 = inlined_call_operand.vmem [shape: f32[1,128], index: 2, kind: input, shape index: {}]   ;;  %s387_s3 = inlined_call_operand.hbm [shape: f32[4,128], index: 3, kind: output, shape index: {}]  }
   0x1   :  { %9 = vsyncpa [#allocation6], 0 }
   0x2   :  { %10 = vsyncpa [#allocation4], 0  ;;  %s310_s12 = smov [#allocation2]   ;;  %s311_s14 = smov [#allocation5]  }
   0x3   :  { %s17_s13 = sshll.u32 %s310_s12, 4  ;;  %s26_s15 = sshll.u32 %s311_s14, 4  ;;  %s18_s13 = int_to_ptr.vmem [resolvable:$true] %s17_s13  ;;  %s338_s15 = int_to_ptr.vmem [resolvable:$true] %s26_s15 }
   0x4   :  { %s238_s18 = scalar_lea.hbm %s384_s0, 64 }
   0x5   :  { %p239_p0 = scmp.ne.s32.totalorder %s384_s0, %s238_s18  ;;  %p242_p1 = scmp.lt.u32.totalorder %s238_s18, %s384_s0 }
   0x7   :  { %p244_p2 = pnand %p242_p1, %p239_p0 }
   0x9   :  { %247 = shalt.err (!%p244_p2)
}
   0xa   :  { %s248_s23 = scalar_lea.vmem %s18_s13, 64  ;;  %p253_p4 = scmp.lt.s32.totalorder %s18_s13, %s18_s13 }
   0xb   :  { %p249_p3 = scmp.ne.s32.totalorder %s18_s13, %s248_s23  ;;  %p254_p5 = scmp.lt.s32.totalorder %s248_s23, %s248_s23 }
   0xd   :  { %p255_p6 = por %p254_p5, %p253_p4 }
   0xf   :  { %p256_p7 = pnand %p255_p6, %p249_p3 }
  0x11   :  { %259 = shalt.err (!%p256_p7)
}
  0x12   :  { %20 = dma.hbm_to_vmem [thread:$0]  %s384_s0, 64, %s18_s13, [#allocation3]  }
  0x13   :  { %s260_s28 = scalar_lea.hbm %s385_s1, 2048 }
  0x14   :  { %p261_p8 = scmp.ne.s32.totalorder %s385_s1, %s260_s28  ;;  %p264_p9 = scmp.lt.u32.totalorder %s260_s28, %s385_s1 }
  0x16   :  { %p266_p10 = pnand %p264_p9, %p261_p8 }
  0x18   :  { %269 = shalt.err (!%p266_p10)
}
  0x19   :  { %s270_s6 = scalar_lea.vmem %s338_s15, 2048  ;;  %p275_p12 = scmp.lt.s32.totalorder %s338_s15, %s338_s15 }
  0x1a   :  { %p271_p11 = scmp.ne.s32.totalorder %s338_s15, %s270_s6  ;;  %p276_p13 = scmp.lt.s32.totalorder %s270_s6, %s270_s6 }
  0x1c   :  { %p277_p0 = por %p276_p13, %p275_p12 }
  0x1e   :  { %p278_p1 = pnand %p277_p0, %p271_p11 }
  0x20   :  { %281 = shalt.err (!%p278_p1)
}
  0x21   :  { %s312_s0 = smov 128   ;;  %s313_s7 = smov 8  }
  0x22   :  { %32 = dma.hbm_to_vmem [thread:$0]  %s385_s1, 2048, %s338_s15, [#allocation6], %s312_s0, %s312_s0, %s313_s7  }
  0x23   :  { %304 = dma.done.wait [#allocation3], 64  }
  0x24   :  { %305 = vsyncadd [#allocation3], 4294967232 }
  0x25   :  { %306 = dma.done.wait [#allocation6], 2048  }
  0x26   :  { %307 = vsyncadd [#allocation6], 4294965248  ;;  %v314_v0 = vmov 0.0|0.0   ;;  %vm315_vm0 = vmmov 0   ;;  %v316_v1 = vmov 0.0   ;;  %v42_v2 = vld [vmem:[#allocation5] sm:$0xff] }
  0x27   :  { %206 = vmatprep.subr.bf16.mxu0 %v314_v0  ;;  %203 = vmatprep.mubr.msk.f32.mxu0 %vm315_vm0, %v316_v1  ;;  %v43_v3 = vld [vmem:[#allocation5 + $0x8] sm:$0xff]  ;;  %v44_v4 = vld [vmem:[#allocation5 + $0x10] sm:$0xff]  ;;  %v45_v6 = vld [vmem:[#allocation5 + $0x18] sm:$0xff]  ;;  %s317_s11 = smov [#allocation7]  }
  0x28   :  { %v207_v5 = vpack.c.bf16 %v43_v3, %v42_v2  ;;  %v210_v7 = vpack.c.bf16 %v45_v6, %v44_v4  ;;  %v46_v8 = vld [vmem:[#allocation5 + $0x20] sm:$0xff]  ;;  %v47_v9 = vld [vmem:[#allocation5 + $0x28] sm:$0xff]  ;;  %v48_v11 = vld [vmem:[#allocation5 + $0x30] sm:$0xff]  ;;  %s143_s12 = sshll.u32 %s317_s11, 4  ;;  %s144_s12 = int_to_ptr.vmem [resolvable:$true] %s143_s12 }
  0x29   :  { %v213_v10 = vpack.c.bf16 %v47_v9, %v46_v8  ;;  %v49_v12 = vld [vmem:[#allocation5 + $0x38] sm:$0xff]  ;;  %v50_v14 = vld [vmem:[#allocation5 + $0x40] sm:$0xff]  ;;  %v51_v15 = vld [vmem:[#allocation5 + $0x48] sm:$0xff]  ;;  %s282_s13 = scalar_lea.vmem %s144_s12, 64  ;;  %p287_p3 = scmp.lt.s32.totalorder %s144_s12, %s144_s12 }
  0x2a   :  { %208 = vmatpush3.bf16.msra.mxu0 %v207_v5  ;;  %v216_v13 = vpack.c.bf16 %v49_v12, %v48_v11  ;;  %v219_v16 = vpack.c.bf16 %v51_v15, %v50_v14  ;;  %v52_v17 = vld [vmem:[#allocation5 + $0x50] sm:$0xff]  ;;  %v53_v18 = vld [vmem:[#allocation5 + $0x58] sm:$0xff]  ;;  %v54_v20 = vld [vmem:[#allocation5 + $0x60] sm:$0xff]  ;;  %p283_p2 = scmp.ne.s32.totalorder %s144_s12, %s282_s13  ;;  %p288_p4 = scmp.lt.s32.totalorder %s282_s13, %s282_s13 }
  0x2b   :  { %209 = vmatprep.subr.bf16.mxu0 %v314_v0  ;;  %v222_v19 = vpack.c.bf16 %v53_v18, %v52_v17  ;;  %v55_v21 = vld [vmem:[#allocation5 + $0x68] sm:$0xff]  ;;  %v56_v23 = vld [vmem:[#allocation5 + $0x70] sm:$0xff]  ;;  %v57_v24 = vld [vmem:[#allocation5 + $0x78] sm:$0xff] }
  0x2c   :  { %v225_v22 = vpack.c.bf16 %v55_v21, %v54_v20  ;;  %v228_v25 = vpack.c.bf16 %v57_v24, %v56_v23  ;;  %v41_v26 = vld [vmem:[#allocation2] sm:$0xf]  ;;  %p289_p5 = por %p288_p4, %p287_p3 }
  0x2d   :  { %v153_v27 = vld [vmem:[%s386_s2] ss:$0 sm:$0xff] }
  0x2e   :  { %211 = vmatpush3.bf16.msra.mxu0 %v210_v7  ;;  %p290_p6 = pnand %p289_p5, %p283_p2 }
  0x2f   :  { %212 = vmatprep.subr.bf16.mxu0 %v314_v0 }
  0x32   :  { %214 = vmatpush3.bf16.msra.mxu0 %v213_v10 }
  0x33   :  { %215 = vmatprep.subr.bf16.mxu0 %v314_v0 }
  0x36   :  { %217 = vmatpush3.bf16.msra.mxu0 %v216_v13 }
  0x37   :  { %218 = vmatprep.subr.bf16.mxu0 %v314_v0 }
  0x3a   :  { %220 = vmatpush3.bf16.msra.mxu0 %v219_v16 }
  0x3b   :  { %221 = vmatprep.subr.bf16.mxu0 %v314_v0 }
  0x3e   :  { %223 = vmatpush3.bf16.msra.mxu0 %v222_v19 }
  0x3f   :  { %224 = vmatprep.subr.bf16.mxu0 %v314_v0 }
  0x42   :  { %226 = vmatpush3.bf16.msra.mxu0 %v225_v22 }
  0x43   :  { %227 = vmatprep.subr.bf16.mxu0 %v314_v0 }
  0x46   :  { %229 = vmatpush3.bf16.msra.mxu0 %v228_v25 }
  0x49   :  { %204 = vmatmul.mubr.f32.vlgmr.msra.gmra.mrb[0].mxu0 %v41_v26 }
 0x11c   :  { %v131_v28 = vpop.f32.mrb[0].mxu0 }
 0x11d   :  { %v132_v29 = vadd.f32 %v153_v27, %v131_v28  ;;  %v205_v30 = vpop.f32.mrb[1].mxu0 }
 0x11f   :  { %v135_v31 = vadd.f32 %v132_v29, %v41_v26 }
 0x121   :  { %136 = vst [vmem:[#allocation7] sm:$0xf] %v135_v31 }
 0x122   :  { %293 = shalt.err (!%p290_p6)
}
 0x123   :  { %s294_s16 = scalar_lea.hbm %s387_s3, 64 }
 0x124   :  { %p295_p7 = scmp.ne.s32.totalorder %s387_s3, %s294_s16  ;;  %p298_p8 = scmp.lt.u32.totalorder %s294_s16, %s387_s3 }
 0x126   :  { %p300_p9 = pnand %p298_p8, %p295_p7 }
 0x128   :  { %303 = shalt.err (!%p300_p9)
}
 0x129   :  { %146 = dma.vmem_to_hbm [thread:$0]  %s144_s12, 64, %s387_s3, [#allocation4]  }
 0x12a   :  { %308 = dma.done.wait [#allocation4], 64  }
 0x12b   :  { %309 = vsyncadd [#allocation4], 4294967232 }
 0x12c   :  { %150 = vsyncpa [#allocation3], 1 }
 0x12d   :  { %151 = vsyncpa [#allocation6], 1 }
 0x12e   :  { %152 = vsyncpa [#allocation4], 1 }

</bundles_post_ra>
